<compile_context>
chip_gen: v6e
topology: v6e:2x2x1
jax: 0.10.0
libtpu: 0.0.40
codegen_flags: <defaults>
</compile_context>

<pallas_src>
import jax
import jax.numpy as jnp
import numpy as np
from jax.experimental import pallas as pl
from jax.experimental.pallas import tpu as pltpu

BATCH = 1
SEQ = 10           # sequence_length
INPUT_DIM = 5
HIDDEN_DIM = 5
NUM_LAYERS = 1

# Packed-parameter layout: every block starts on an 8-row sublane-tile
# boundary so in-kernel slices are plain vreg loads (no sublane shuffles).
PACK_LANES = 8
R_WIH = 0     # W_ih            (H, IN)
R_WHH = 8     # W_hh            (H, H)
R_WHHT = 16   # W_hh^T          (H, H)
R_WFCT = 24   # W_fc^T          (H, H)
R_EYE = 32    # identity        (H, H)   (for row<->column relayout via reduce)
R_BROW = 40   # b_ih + b_hh     (1, H)   row form
R_BFC = 48    # b_fc            (1, H)   row form
R_BCOL = 56   # b_ih + b_hh     (H, 1)   column form
PACK_ROWS = 64


def rnn_fc_kernel(x_ref, h0_ref, p_ref, out_ref):
    # x_ref  : (SEQ, INPUT_DIM)        f32
    # h0_ref : (1, HIDDEN_DIM)         f32   initial hidden state (row-held)
    # p_ref  : (PACK_ROWS, PACK_LANES) f32   packed constants (see layout above)
    # out_ref: (SEQ, HIDDEN_DIM)       f32
    H = HIDDEN_DIM
    x = x_ref[...]
    params = p_ref[...]

    w_ih = params[R_WIH:R_WIH + H, 0:INPUT_DIM]      # (H, IN)
    w_hh = params[R_WHH:R_WHH + H, 0:H]              # (H, H)
    w_hhT = params[R_WHHT:R_WHHT + H, 0:H]           # (H, H)
    w_fcT = params[R_WFCT:R_WFCT + H, 0:H]           # (H, H)
    eye = params[R_EYE:R_EYE + H, 0:H]               # (H, H)
    b_row = params[R_BROW:R_BROW + 1, 0:H]           # (1, H)  b_ih + b_hh
    bfc_row = params[R_BFC:R_BFC + 1, 0:H]           # (1, H)
    b_col = params[R_BCOL:R_BCOL + H, 0:1]           # (H, 1)  b_ih + b_hh

    # Reductions stay on the 5-element logical extent (Mosaic handles vreg
    # padding); see item-4 note in the header for why no manual roll tree.
    def lane_reduce(m):       # (H, H) -> (H, 1): reduce over lanes
        return jnp.sum(m, axis=1, keepdims=True)

    def sublane_reduce(m):    # (H, H) -> (1, H): reduce over sublanes
        return jnp.sum(m, axis=0, keepdims=True)

    def col_to_row(v_col):    # (H, 1) -> (1, H) via identity mask (VPU + XLU)
        return sublane_reduce(jnp.broadcast_to(v_col, (H, H)) * eye)

    def row_to_col(v_row):    # (1, H) -> (H, 1) via identity mask
        return lane_reduce(jnp.broadcast_to(v_row, (H, H)) * eye)

    # Hidden state alternates row-held / column-held so the serial chain never
    # needs a relayout.  All values below live in vregs (no scratch).
    h_row = h0_ref[...]       # (1, H)
    h_col = None

    for t in range(SEQ):      # static trip count -> fully unrolled
        x_row = x[t:t + 1, :]                                        # (1, IN)
        # Input projection p_t[n] = sum_k W_ih[n,k] x_t[k]  (off the chain).
        p_col = lane_reduce(jnp.broadcast_to(x_row, (H, INPUT_DIM)) * w_ih)

        if t % 2 == 0:
            # h_{t-1} row-held -> h_t column-held.
            hh_col = lane_reduce(jnp.broadcast_to(h_row, (H, H)) * w_hh)
            h_col = jnp.tanh(p_col + b_col + hh_col)                 # (H, 1)
            fc_in_col = h_col
        else:
            # h_{t-1} column-held -> h_t row-held.
            hh_row = sublane_reduce(jnp.broadcast_to(h_col, (H, H)) * w_hhT)
            p_row = col_to_row(p_col)                                # off-chain
            h_row = jnp.tanh(p_row + b_row + hh_row)                 # (1, H)
            fc_in_col = row_to_col(h_row)                            # off-chain

        # FC head in-loop (free filler under the tanh/reduce chain):
        #   y_t[m] = sum_n W_fc[m,n] h_t[n] + b_fc[m]
        y_row = sublane_reduce(jnp.broadcast_to(fc_in_col, (H, H)) * w_fcT) + bfc_row
        out_ref[t:t + 1, :] = y_row                 # off-chain row store


def pack_params(params):
    """Pack weights/biases into one aligned tile.  Call ONCE (constants)."""
    w_ih, w_hh, b_ih, b_hh, w_fc, b_fc = params
    H = HIDDEN_DIM
    b = (b_ih + b_hh).astype(jnp.float32)
    p = jnp.zeros((PACK_ROWS, PACK_LANES), jnp.float32)
    p = p.at[R_WIH:R_WIH + H, 0:INPUT_DIM].set(w_ih.astype(jnp.float32))
    p = p.at[R_WHH:R_WHH + H, 0:H].set(w_hh.astype(jnp.float32))
    p = p.at[R_WHHT:R_WHHT + H, 0:H].set(w_hh.T.astype(jnp.float32))
    p = p.at[R_WFCT:R_WFCT + H, 0:H].set(w_fc.T.astype(jnp.float32))
    p = p.at[R_EYE:R_EYE + H, 0:H].set(jnp.eye(H, dtype=jnp.float32))
    p = p.at[R_BROW, 0:H].set(b)
    p = p.at[R_BFC, 0:H].set(b_fc.astype(jnp.float32))
    p = p.at[R_BCOL:R_BCOL + H, 0].set(b)
    return p


@jax.jit
def rnn_forward(hidden, x, packed_params):
    """Mirrors RNN.forward(hidden, x): returns (BATCH, SEQ, HIDDEN_DIM)."""
    x2 = x.reshape(SEQ, INPUT_DIM).astype(jnp.float32)       # batch=1 folded out
    h0 = hidden.reshape(1, HIDDEN_DIM).astype(jnp.float32)   # (1, H)

    vmem = pl.BlockSpec(memory_space=pltpu.MemorySpace.VMEM)
    out = pl.pallas_call(
        rnn_fc_kernel,
        out_shape=jax.ShapeDtypeStruct((SEQ, HIDDEN_DIM), jnp.float32),
        in_specs=[vmem, vmem, vmem],
        out_specs=vmem,
    )(x2, h0, packed_params)
    return out.reshape(BATCH, SEQ, HIDDEN_DIM)


def rnn_forward_ref(hidden, x, params):
    """Pure-JAX reference matching PyTorch nn.RNN + nn.Linear semantics."""
    w_ih, w_hh, b_ih, b_hh, w_fc, b_fc = params
    xs = x.reshape(BATCH, SEQ, INPUT_DIM)[0]
    h = hidden.reshape(HIDDEN_DIM)
    outs = []
    for t in range(SEQ):
        h = jnp.tanh(xs[t] @ w_ih.T + b_ih + h @ w_hh.T + b_hh)
        outs.append(h @ w_fc.T + b_fc)
    return jnp.stack(outs)[None]


if __name__ == "__main__":
    key = jax.random.PRNGKey(0)
    kx, kp = jax.random.split(key)

    # Inputs implied by forward(): x viewable to (1, 10, 5); hidden from init_hidden().
    x = jax.random.normal(kx, (BATCH, SEQ, INPUT_DIM), dtype=jnp.float32)
    hidden = jnp.zeros((NUM_LAYERS, BATCH, HIDDEN_DIM), dtype=jnp.float32)

    # Deterministic parameter init (PyTorch-style uniform(-1/sqrt(H), 1/sqrt(H))).
    bound = 1.0 / float(np.sqrt(HIDDEN_DIM))
    keys = jax.random.split(kp, 6)
    w_ih = jax.random.uniform(keys[0], (HIDDEN_DIM, INPUT_DIM), jnp.float32, -bound, bound)
    w_hh = jax.random.uniform(keys[1], (HIDDEN_DIM, HIDDEN_DIM), jnp.float32, -bound, bound)
    b_ih = jax.random.uniform(keys[2], (HIDDEN_DIM,), jnp.float32, -bound, bound)
    b_hh = jax.random.uniform(keys[3], (HIDDEN_DIM,), jnp.float32, -bound, bound)
    w_fc = jax.random.uniform(keys[4], (HIDDEN_DIM, HIDDEN_DIM), jnp.float32, -bound, bound)
    b_fc = jax.random.uniform(keys[5], (HIDDEN_DIM,), jnp.float32, -bound, bound)
    params = (w_ih, w_hh, b_ih, b_hh, w_fc, b_fc)

    # Parameters are constants across calls: pack once, outside the call path.
    packed = jax.block_until_ready(pack_params(params))

    out = jax.block_until_ready(rnn_forward(hidden, x, packed))
    ref = rnn_forward_ref(hidden, x, params)

    assert out.shape == (BATCH, SEQ, HIDDEN_DIM) and out.dtype == jnp.float32
    np.testing.assert_allclose(np.asarray(out), np.asarray(ref), rtol=1e-5, atol=1e-5)
    print("KERNEL_OK")
</pallas_src>

<mosaic_0001>
module attributes {stable_mosaic.version = 11 : i64} {
  func.func @rnn_fc_kernel(%arg0: memref<10x5xf32, #tpu.memory_space<vmem>>, %arg1: memref<1x5xf32, #tpu.memory_space<vmem>>, %arg2: memref<64x8xf32, #tpu.memory_space<vmem>>, %arg3: memref<10x5xf32, #tpu.memory_space<vmem>>) attributes {dimension_semantics = [], scalar_prefetch = 0 : i64, scratch_operands = 0 : i64, tpu.core_type = #tpu.core_type<tc>} {
    %c0 = arith.constant 0 : index
    %c0_0 = arith.constant 0 : index
    %0 = vector.load %arg0[%c0, %c0_0] : memref<10x5xf32, #tpu.memory_space<vmem>>, vector<10x5xf32>
    %c0_1 = arith.constant 0 : index
    %c0_2 = arith.constant 0 : index
    %1 = vector.load %arg2[%c0_1, %c0_2] : memref<64x8xf32, #tpu.memory_space<vmem>>, vector<64x8xf32>
    %2 = vector.extract_strided_slice %1 {offsets = [0, 0], sizes = [5, 5], strides = [1, 1]} : vector<64x8xf32> to vector<5x5xf32>
    %3 = vector.extract_strided_slice %1 {offsets = [8, 0], sizes = [5, 5], strides = [1, 1]} : vector<64x8xf32> to vector<5x5xf32>
    %4 = vector.extract_strided_slice %1 {offsets = [16, 0], sizes = [5, 5], strides = [1, 1]} : vector<64x8xf32> to vector<5x5xf32>
    %5 = vector.extract_strided_slice %1 {offsets = [24, 0], sizes = [5, 5], strides = [1, 1]} : vector<64x8xf32> to vector<5x5xf32>
    %6 = vector.extract_strided_slice %1 {offsets = [32, 0], sizes = [5, 5], strides = [1, 1]} : vector<64x8xf32> to vector<5x5xf32>
    %7 = vector.extract_strided_slice %1 {offsets = [40, 0], sizes = [1, 5], strides = [1, 1]} : vector<64x8xf32> to vector<1x5xf32>
    %8 = vector.extract_strided_slice %1 {offsets = [48, 0], sizes = [1, 5], strides = [1, 1]} : vector<64x8xf32> to vector<1x5xf32>
    %9 = vector.extract_strided_slice %1 {offsets = [56, 0], sizes = [5, 1], strides = [1, 1]} : vector<64x8xf32> to vector<5x1xf32>
    %c0_3 = arith.constant 0 : index
    %c0_4 = arith.constant 0 : index
    %10 = vector.load %arg1[%c0_3, %c0_4] : memref<1x5xf32, #tpu.memory_space<vmem>>, vector<1x5xf32>
    %11 = vector.extract_strided_slice %0 {offsets = [0, 0], sizes = [1, 5], strides = [1, 1]} : vector<10x5xf32> to vector<1x5xf32>
    %12 = vector.shape_cast %11 : vector<1x5xf32> to vector<1x5xf32>
    %13 = vector.broadcast %12 : vector<1x5xf32> to vector<5x5xf32>
    %14 = arith.mulf %13, %2 : vector<5x5xf32>
    %cst = arith.constant dense<0.000000e+00> : vector<5xf32>
    %15 = vector.multi_reduction <add>, %14, %cst [1] : vector<5x5xf32> to vector<5xf32>
    %16 = vector.shape_cast %15 : vector<5xf32> to vector<5x1xf32>
    %17 = vector.shape_cast %10 : vector<1x5xf32> to vector<1x5xf32>
    %18 = vector.broadcast %17 : vector<1x5xf32> to vector<5x5xf32>
    %19 = arith.mulf %18, %3 : vector<5x5xf32>
    %cst_5 = arith.constant dense<0.000000e+00> : vector<5xf32>
    %20 = vector.multi_reduction <add>, %19, %cst_5 [1] : vector<5x5xf32> to vector<5xf32>
    %21 = vector.shape_cast %20 : vector<5xf32> to vector<5x1xf32>
    %22 = arith.addf %16, %9 : vector<5x1xf32>
    %23 = arith.addf %22, %21 : vector<5x1xf32>
    %24 = math.tanh %23 : vector<5x1xf32>
    %25 = vector.shape_cast %24 : vector<5x1xf32> to vector<5x1xf32>
    %26 = vector.broadcast %25 : vector<5x1xf32> to vector<5x5xf32>
    %27 = arith.mulf %26, %5 : vector<5x5xf32>
    %cst_6 = arith.constant dense<0.000000e+00> : vector<5xf32>
    %28 = vector.multi_reduction <add>, %27, %cst_6 [0] : vector<5x5xf32> to vector<5xf32>
    %29 = vector.shape_cast %28 : vector<5xf32> to vector<1x5xf32>
    %30 = arith.addf %29, %8 : vector<1x5xf32>
    %c0_7 = arith.constant 0 : index
    %c0_8 = arith.constant 0 : index
    %31 = vector.load %arg3[%c0_7, %c0_8] : memref<10x5xf32, #tpu.memory_space<vmem>>, vector<1x5xf32>
    tpu.vector_store %arg3[%c0_7, %c0_8], %30 {strides = array<i32>} : memref<10x5xf32, #tpu.memory_space<vmem>>, vector<1x5xf32>,
    %32 = vector.extract_strided_slice %0 {offsets = [1, 0], sizes = [1, 5], strides = [1, 1]} : vector<10x5xf32> to vector<1x5xf32>
    %33 = vector.shape_cast %32 : vector<1x5xf32> to vector<1x5xf32>
    %34 = vector.broadcast %33 : vector<1x5xf32> to vector<5x5xf32>
    %35 = arith.mulf %34, %2 : vector<5x5xf32>
    %cst_9 = arith.constant dense<0.000000e+00> : vector<5xf32>
    %36 = vector.multi_reduction <add>, %35, %cst_9 [1] : vector<5x5xf32> to vector<5xf32>
    %37 = vector.shape_cast %36 : vector<5xf32> to vector<5x1xf32>
    %38 = vector.shape_cast %24 : vector<5x1xf32> to vector<5x1xf32>
    %39 = vector.broadcast %38 : vector<5x1xf32> to vector<5x5xf32>
    %40 = arith.mulf %39, %4 : vector<5x5xf32>
    %cst_10 = arith.constant dense<0.000000e+00> : vector<5xf32>
    %41 = vector.multi_reduction <add>, %40, %cst_10 [0] : vector<5x5xf32> to vector<5xf32>
    %42 = vector.shape_cast %41 : vector<5xf32> to vector<1x5xf32>
    %43 = vector.shape_cast %37 : vector<5x1xf32> to vector<5x1xf32>
    %44 = vector.broadcast %43 : vector<5x1xf32> to vector<5x5xf32>
    %45 = arith.mulf %44, %6 : vector<5x5xf32>
    %cst_11 = arith.constant dense<0.000000e+00> : vector<5xf32>
    %46 = vector.multi_reduction <add>, %45, %cst_11 [0] : vector<5x5xf32> to vector<5xf32>
    %47 = vector.shape_cast %46 : vector<5xf32> to vector<1x5xf32>
    %48 = arith.addf %47, %7 : vector<1x5xf32>
    %49 = arith.addf %48, %42 : vector<1x5xf32>
    %50 = math.tanh %49 : vector<1x5xf32>
    %51 = vector.shape_cast %50 : vector<1x5xf32> to vector<1x5xf32>
    %52 = vector.broadcast %51 : vector<1x5xf32> to vector<5x5xf32>
    %53 = arith.mulf %52, %6 : vector<5x5xf32>
    %cst_12 = arith.constant dense<0.000000e+00> : vector<5xf32>
    %54 = vector.multi_reduction <add>, %53, %cst_12 [1] : vector<5x5xf32> to vector<5xf32>
    %55 = vector.shape_cast %54 : vector<5xf32> to vector<5x1xf32>
    %56 = vector.shape_cast %55 : vector<5x1xf32> to vector<5x1xf32>
    %57 = vector.broadcast %56 : vector<5x1xf32> to vector<5x5xf32>
    %58 = arith.mulf %57, %5 : vector<5x5xf32>
    %cst_13 = arith.constant dense<0.000000e+00> : vector<5xf32>
    %59 = vector.multi_reduction <add>, %58, %cst_13 [0] : vector<5x5xf32> to vector<5xf32>
    %60 = vector.shape_cast %59 : vector<5xf32> to vector<1x5xf32>
    %61 = arith.addf %60, %8 : vector<1x5xf32>
    %c1 = arith.constant 1 : index
    %c0_14 = arith.constant 0 : index
    %62 = vector.load %arg3[%c1, %c0_14] : memref<10x5xf32, #tpu.memory_space<vmem>>, vector<1x5xf32>
    tpu.vector_store %arg3[%c1, %c0_14], %61 {strides = array<i32>} : memref<10x5xf32, #tpu.memory_space<vmem>>, vector<1x5xf32>,
    %63 = vector.extract_strided_slice %0 {offsets = [2, 0], sizes = [1, 5], strides = [1, 1]} : vector<10x5xf32> to vector<1x5xf32>
    %64 = vector.shape_cast %63 : vector<1x5xf32> to vector<1x5xf32>
    %65 = vector.broadcast %64 : vector<1x5xf32> to vector<5x5xf32>
    %66 = arith.mulf %65, %2 : vector<5x5xf32>
    %cst_15 = arith.constant dense<0.000000e+00> : vector<5xf32>
    %67 = vector.multi_reduction <add>, %66, %cst_15 [1] : vector<5x5xf32> to vector<5xf32>
    %68 = vector.shape_cast %67 : vector<5xf32> to vector<5x1xf32>
    %69 = vector.shape_cast %50 : vector<1x5xf32> to vector<1x5xf32>
    %70 = vector.broadcast %69 : vector<1x5xf32> to vector<5x5xf32>
    %71 = arith.mulf %70, %3 : vector<5x5xf32>
    %cst_16 = arith.constant dense<0.000000e+00> : vector<5xf32>
    %72 = vector.multi_reduction <add>, %71, %cst_16 [1] : vector<5x5xf32> to vector<5xf32>
    %73 = vector.shape_cast %72 : vector<5xf32> to vector<5x1xf32>
    %74 = arith.addf %68, %9 : vector<5x1xf32>
    %75 = arith.addf %74, %73 : vector<5x1xf32>
    %76 = math.tanh %75 : vector<5x1xf32>
    %77 = vector.shape_cast %76 : vector<5x1xf32> to vector<5x1xf32>
    %78 = vector.broadcast %77 : vector<5x1xf32> to vector<5x5xf32>
    %79 = arith.mulf %78, %5 : vector<5x5xf32>
    %cst_17 = arith.constant dense<0.000000e+00> : vector<5xf32>
    %80 = vector.multi_reduction <add>, %79, %cst_17 [0] : vector<5x5xf32> to vector<5xf32>
    %81 = vector.shape_cast %80 : vector<5xf32> to vector<1x5xf32>
    %82 = arith.addf %81, %8 : vector<1x5xf32>
    %c2 = arith.constant 2 : index
    %c0_18 = arith.constant 0 : index
    %83 = vector.load %arg3[%c2, %c0_18] : memref<10x5xf32, #tpu.memory_space<vmem>>, vector<1x5xf32>
    tpu.vector_store %arg3[%c2, %c0_18], %82 {strides = array<i32>} : memref<10x5xf32, #tpu.memory_space<vmem>>, vector<1x5xf32>,
    %84 = vector.extract_strided_slice %0 {offsets = [3, 0], sizes = [1, 5], strides = [1, 1]} : vector<10x5xf32> to vector<1x5xf32>
    %85 = vector.shape_cast %84 : vector<1x5xf32> to vector<1x5xf32>
    %86 = vector.broadcast %85 : vector<1x5xf32> to vector<5x5xf32>
    %87 = arith.mulf %86, %2 : vector<5x5xf32>
    %cst_19 = arith.constant dense<0.000000e+00> : vector<5xf32>
    %88 = vector.multi_reduction <add>, %87, %cst_19 [1] : vector<5x5xf32> to vector<5xf32>
    %89 = vector.shape_cast %88 : vector<5xf32> to vector<5x1xf32>
    %90 = vector.shape_cast %76 : vector<5x1xf32> to vector<5x1xf32>
    %91 = vector.broadcast %90 : vector<5x1xf32> to vector<5x5xf32>
    %92 = arith.mulf %91, %4 : vector<5x5xf32>
    %cst_20 = arith.constant dense<0.000000e+00> : vector<5xf32>
    %93 = vector.multi_reduction <add>, %92, %cst_20 [0] : vector<5x5xf32> to vector<5xf32>
    %94 = vector.shape_cast %93 : vector<5xf32> to vector<1x5xf32>
    %95 = vector.shape_cast %89 : vector<5x1xf32> to vector<5x1xf32>
    %96 = vector.broadcast %95 : vector<5x1xf32> to vector<5x5xf32>
    %97 = arith.mulf %96, %6 : vector<5x5xf32>
    %cst_21 = arith.constant dense<0.000000e+00> : vector<5xf32>
    %98 = vector.multi_reduction <add>, %97, %cst_21 [0] : vector<5x5xf32> to vector<5xf32>
    %99 = vector.shape_cast %98 : vector<5xf32> to vector<1x5xf32>
    %100 = arith.addf %99, %7 : vector<1x5xf32>
    %101 = arith.addf %100, %94 : vector<1x5xf32>
    %102 = math.tanh %101 : vector<1x5xf32>
    %103 = vector.shape_cast %102 : vector<1x5xf32> to vector<1x5xf32>
    %104 = vector.broadcast %103 : vector<1x5xf32> to vector<5x5xf32>
    %105 = arith.mulf %104, %6 : vector<5x5xf32>
    %cst_22 = arith.constant dense<0.000000e+00> : vector<5xf32>
    %106 = vector.multi_reduction <add>, %105, %cst_22 [1] : vector<5x5xf32> to vector<5xf32>
    %107 = vector.shape_cast %106 : vector<5xf32> to vector<5x1xf32>
    %108 = vector.shape_cast %107 : vector<5x1xf32> to vector<5x1xf32>
    %109 = vector.broadcast %108 : vector<5x1xf32> to vector<5x5xf32>
    %110 = arith.mulf %109, %5 : vector<5x5xf32>
    %cst_23 = arith.constant dense<0.000000e+00> : vector<5xf32>
    %111 = vector.multi_reduction <add>, %110, %cst_23 [0] : vector<5x5xf32> to vector<5xf32>
    %112 = vector.shape_cast %111 : vector<5xf32> to vector<1x5xf32>
    %113 = arith.addf %112, %8 : vector<1x5xf32>
    %c3 = arith.constant 3 : index
    %c0_24 = arith.constant 0 : index
    %114 = vector.load %arg3[%c3, %c0_24] : memref<10x5xf32, #tpu.memory_space<vmem>>, vector<1x5xf32>
    tpu.vector_store %arg3[%c3, %c0_24], %113 {strides = array<i32>} : memref<10x5xf32, #tpu.memory_space<vmem>>, vector<1x5xf32>,
    %115 = vector.extract_strided_slice %0 {offsets = [4, 0], sizes = [1, 5], strides = [1, 1]} : vector<10x5xf32> to vector<1x5xf32>
    %116 = vector.shape_cast %115 : vector<1x5xf32> to vector<1x5xf32>
    %117 = vector.broadcast %116 : vector<1x5xf32> to vector<5x5xf32>
    %118 = arith.mulf %117, %2 : vector<5x5xf32>
    %cst_25 = arith.constant dense<0.000000e+00> : vector<5xf32>
    %119 = vector.multi_reduction <add>, %118, %cst_25 [1] : vector<5x5xf32> to vector<5xf32>
    %120 = vector.shape_cast %119 : vector<5xf32> to vector<5x1xf32>
    %121 = vector.shape_cast %102 : vector<1x5xf32> to vector<1x5xf32>
    %122 = vector.broadcast %121 : vector<1x5xf32> to vector<5x5xf32>
    %123 = arith.mulf %122, %3 : vector<5x5xf32>
    %cst_26 = arith.constant dense<0.000000e+00> : vector<5xf32>
    %124 = vector.multi_reduction <add>, %123, %cst_26 [1] : vector<5x5xf32> to vector<5xf32>
    %125 = vector.shape_cast %124 : vector<5xf32> to vector<5x1xf32>
    %126 = arith.addf %120, %9 : vector<5x1xf32>
    %127 = arith.addf %126, %125 : vector<5x1xf32>
    %128 = math.tanh %127 : vector<5x1xf32>
    %129 = vector.shape_cast %128 : vector<5x1xf32> to vector<5x1xf32>
    %130 = vector.broadcast %129 : vector<5x1xf32> to vector<5x5xf32>
    %131 = arith.mulf %130, %5 : vector<5x5xf32>
    %cst_27 = arith.constant dense<0.000000e+00> : vector<5xf32>
    %132 = vector.multi_reduction <add>, %131, %cst_27 [0] : vector<5x5xf32> to vector<5xf32>
    %133 = vector.shape_cast %132 : vector<5xf32> to vector<1x5xf32>
    %134 = arith.addf %133, %8 : vector<1x5xf32>
    %c4 = arith.constant 4 : index
    %c0_28 = arith.constant 0 : index
    %135 = vector.load %arg3[%c4, %c0_28] : memref<10x5xf32, #tpu.memory_space<vmem>>, vector<1x5xf32>
    tpu.vector_store %arg3[%c4, %c0_28], %134 {strides = array<i32>} : memref<10x5xf32, #tpu.memory_space<vmem>>, vector<1x5xf32>,
    %136 = vector.extract_strided_slice %0 {offsets = [5, 0], sizes = [1, 5], strides = [1, 1]} : vector<10x5xf32> to vector<1x5xf32>
    %137 = vector.shape_cast %136 : vector<1x5xf32> to vector<1x5xf32>
    %138 = vector.broadcast %137 : vector<1x5xf32> to vector<5x5xf32>
    %139 = arith.mulf %138, %2 : vector<5x5xf32>
    %cst_29 = arith.constant dense<0.000000e+00> : vector<5xf32>
    %140 = vector.multi_reduction <add>, %139, %cst_29 [1] : vector<5x5xf32> to vector<5xf32>
    %141 = vector.shape_cast %140 : vector<5xf32> to vector<5x1xf32>
    %142 = vector.shape_cast %128 : vector<5x1xf32> to vector<5x1xf32>
    %143 = vector.broadcast %142 : vector<5x1xf32> to vector<5x5xf32>
    %144 = arith.mulf %143, %4 : vector<5x5xf32>
    %cst_30 = arith.constant dense<0.000000e+00> : vector<5xf32>
    %145 = vector.multi_reduction <add>, %144, %cst_30 [0] : vector<5x5xf32> to vector<5xf32>
    %146 = vector.shape_cast %145 : vector<5xf32> to vector<1x5xf32>
    %147 = vector.shape_cast %141 : vector<5x1xf32> to vector<5x1xf32>
    %148 = vector.broadcast %147 : vector<5x1xf32> to vector<5x5xf32>
    %149 = arith.mulf %148, %6 : vector<5x5xf32>
    %cst_31 = arith.constant dense<0.000000e+00> : vector<5xf32>
    %150 = vector.multi_reduction <add>, %149, %cst_31 [0] : vector<5x5xf32> to vector<5xf32>
    %151 = vector.shape_cast %150 : vector<5xf32> to vector<1x5xf32>
    %152 = arith.addf %151, %7 : vector<1x5xf32>
    %153 = arith.addf %152, %146 : vector<1x5xf32>
    %154 = math.tanh %153 : vector<1x5xf32>
    %155 = vector.shape_cast %154 : vector<1x5xf32> to vector<1x5xf32>
    %156 = vector.broadcast %155 : vector<1x5xf32> to vector<5x5xf32>
    %157 = arith.mulf %156, %6 : vector<5x5xf32>
    %cst_32 = arith.constant dense<0.000000e+00> : vector<5xf32>
    %158 = vector.multi_reduction <add>, %157, %cst_32 [1] : vector<5x5xf32> to vector<5xf32>
    %159 = vector.shape_cast %158 : vector<5xf32> to vector<5x1xf32>
    %160 = vector.shape_cast %159 : vector<5x1xf32> to vector<5x1xf32>
    %161 = vector.broadcast %160 : vector<5x1xf32> to vector<5x5xf32>
    %162 = arith.mulf %161, %5 : vector<5x5xf32>
    %cst_33 = arith.constant dense<0.000000e+00> : vector<5xf32>
    %163 = vector.multi_reduction <add>, %162, %cst_33 [0] : vector<5x5xf32> to vector<5xf32>
    %164 = vector.shape_cast %163 : vector<5xf32> to vector<1x5xf32>
    %165 = arith.addf %164, %8 : vector<1x5xf32>
    %c5 = arith.constant 5 : index
    %c0_34 = arith.constant 0 : index
    %166 = vector.load %arg3[%c5, %c0_34] : memref<10x5xf32, #tpu.memory_space<vmem>>, vector<1x5xf32>
    tpu.vector_store %arg3[%c5, %c0_34], %165 {strides = array<i32>} : memref<10x5xf32, #tpu.memory_space<vmem>>, vector<1x5xf32>,
    %167 = vector.extract_strided_slice %0 {offsets = [6, 0], sizes = [1, 5], strides = [1, 1]} : vector<10x5xf32> to vector<1x5xf32>
    %168 = vector.shape_cast %167 : vector<1x5xf32> to vector<1x5xf32>
    %169 = vector.broadcast %168 : vector<1x5xf32> to vector<5x5xf32>
    %170 = arith.mulf %169, %2 : vector<5x5xf32>
    %cst_35 = arith.constant dense<0.000000e+00> : vector<5xf32>
    %171 = vector.multi_reduction <add>, %170, %cst_35 [1] : vector<5x5xf32> to vector<5xf32>
    %172 = vector.shape_cast %171 : vector<5xf32> to vector<5x1xf32>
    %173 = vector.shape_cast %154 : vector<1x5xf32> to vector<1x5xf32>
    %174 = vector.broadcast %173 : vector<1x5xf32> to vector<5x5xf32>
    %175 = arith.mulf %174, %3 : vector<5x5xf32>
    %cst_36 = arith.constant dense<0.000000e+00> : vector<5xf32>
    %176 = vector.multi_reduction <add>, %175, %cst_36 [1] : vector<5x5xf32> to vector<5xf32>
    %177 = vector.shape_cast %176 : vector<5xf32> to vector<5x1xf32>
    %178 = arith.addf %172, %9 : vector<5x1xf32>
    %179 = arith.addf %178, %177 : vector<5x1xf32>
    %180 = math.tanh %179 : vector<5x1xf32>
    %181 = vector.shape_cast %180 : vector<5x1xf32> to vector<5x1xf32>
    %182 = vector.broadcast %181 : vector<5x1xf32> to vector<5x5xf32>
    %183 = arith.mulf %182, %5 : vector<5x5xf32>
    %cst_37 = arith.constant dense<0.000000e+00> : vector<5xf32>
    %184 = vector.multi_reduction <add>, %183, %cst_37 [0] : vector<5x5xf32> to vector<5xf32>
    %185 = vector.shape_cast %184 : vector<5xf32> to vector<1x5xf32>
    %186 = arith.addf %185, %8 : vector<1x5xf32>
    %c6 = arith.constant 6 : index
    %c0_38 = arith.constant 0 : index
    %187 = vector.load %arg3[%c6, %c0_38] : memref<10x5xf32, #tpu.memory_space<vmem>>, vector<1x5xf32>
    tpu.vector_store %arg3[%c6, %c0_38], %186 {strides = array<i32>} : memref<10x5xf32, #tpu.memory_space<vmem>>, vector<1x5xf32>,
    %188 = vector.extract_strided_slice %0 {offsets = [7, 0], sizes = [1, 5], strides = [1, 1]} : vector<10x5xf32> to vector<1x5xf32>
    %189 = vector.shape_cast %188 : vector<1x5xf32> to vector<1x5xf32>
    %190 = vector.broadcast %189 : vector<1x5xf32> to vector<5x5xf32>
    %191 = arith.mulf %190, %2 : vector<5x5xf32>
    %cst_39 = arith.constant dense<0.000000e+00> : vector<5xf32>
    %192 = vector.multi_reduction <add>, %191, %cst_39 [1] : vector<5x5xf32> to vector<5xf32>
    %193 = vector.shape_cast %192 : vector<5xf32> to vector<5x1xf32>
    %194 = vector.shape_cast %180 : vector<5x1xf32> to vector<5x1xf32>
    %195 = vector.broadcast %194 : vector<5x1xf32> to vector<5x5xf32>
    %196 = arith.mulf %195, %4 : vector<5x5xf32>
    %cst_40 = arith.constant dense<0.000000e+00> : vector<5xf32>
    %197 = vector.multi_reduction <add>, %196, %cst_40 [0] : vector<5x5xf32> to vector<5xf32>
    %198 = vector.shape_cast %197 : vector<5xf32> to vector<1x5xf32>
    %199 = vector.shape_cast %193 : vector<5x1xf32> to vector<5x1xf32>
    %200 = vector.broadcast %199 : vector<5x1xf32> to vector<5x5xf32>
    %201 = arith.mulf %200, %6 : vector<5x5xf32>
    %cst_41 = arith.constant dense<0.000000e+00> : vector<5xf32>
    %202 = vector.multi_reduction <add>, %201, %cst_41 [0] : vector<5x5xf32> to vector<5xf32>
    %203 = vector.shape_cast %202 : vector<5xf32> to vector<1x5xf32>
    %204 = arith.addf %203, %7 : vector<1x5xf32>
    %205 = arith.addf %204, %198 : vector<1x5xf32>
    %206 = math.tanh %205 : vector<1x5xf32>
    %207 = vector.shape_cast %206 : vector<1x5xf32> to vector<1x5xf32>
    %208 = vector.broadcast %207 : vector<1x5xf32> to vector<5x5xf32>
    %209 = arith.mulf %208, %6 : vector<5x5xf32>
    %cst_42 = arith.constant dense<0.000000e+00> : vector<5xf32>
    %210 = vector.multi_reduction <add>, %209, %cst_42 [1] : vector<5x5xf32> to vector<5xf32>
    %211 = vector.shape_cast %210 : vector<5xf32> to vector<5x1xf32>
    %212 = vector.shape_cast %211 : vector<5x1xf32> to vector<5x1xf32>
    %213 = vector.broadcast %212 : vector<5x1xf32> to vector<5x5xf32>
    %214 = arith.mulf %213, %5 : vector<5x5xf32>
    %cst_43 = arith.constant dense<0.000000e+00> : vector<5xf32>
    %215 = vector.multi_reduction <add>, %214, %cst_43 [0] : vector<5x5xf32> to vector<5xf32>
    %216 = vector.shape_cast %215 : vector<5xf32> to vector<1x5xf32>
    %217 = arith.addf %216, %8 : vector<1x5xf32>
    %c7 = arith.constant 7 : index
    %c0_44 = arith.constant 0 : index
    %218 = vector.load %arg3[%c7, %c0_44] : memref<10x5xf32, #tpu.memory_space<vmem>>, vector<1x5xf32>
    tpu.vector_store %arg3[%c7, %c0_44], %217 {strides = array<i32>} : memref<10x5xf32, #tpu.memory_space<vmem>>, vector<1x5xf32>,
    %219 = vector.extract_strided_slice %0 {offsets = [8, 0], sizes = [1, 5], strides = [1, 1]} : vector<10x5xf32> to vector<1x5xf32>
    %220 = vector.shape_cast %219 : vector<1x5xf32> to vector<1x5xf32>
    %221 = vector.broadcast %220 : vector<1x5xf32> to vector<5x5xf32>
    %222 = arith.mulf %221, %2 : vector<5x5xf32>
    %cst_45 = arith.constant dense<0.000000e+00> : vector<5xf32>
    %223 = vector.multi_reduction <add>, %222, %cst_45 [1] : vector<5x5xf32> to vector<5xf32>
    %224 = vector.shape_cast %223 : vector<5xf32> to vector<5x1xf32>
    %225 = vector.shape_cast %206 : vector<1x5xf32> to vector<1x5xf32>
    %226 = vector.broadcast %225 : vector<1x5xf32> to vector<5x5xf32>
    %227 = arith.mulf %226, %3 : vector<5x5xf32>
    %cst_46 = arith.constant dense<0.000000e+00> : vector<5xf32>
    %228 = vector.multi_reduction <add>, %227, %cst_46 [1] : vector<5x5xf32> to vector<5xf32>
    %229 = vector.shape_cast %228 : vector<5xf32> to vector<5x1xf32>
    %230 = arith.addf %224, %9 : vector<5x1xf32>
    %231 = arith.addf %230, %229 : vector<5x1xf32>
    %232 = math.tanh %231 : vector<5x1xf32>
    %233 = vector.shape_cast %232 : vector<5x1xf32> to vector<5x1xf32>
    %234 = vector.broadcast %233 : vector<5x1xf32> to vector<5x5xf32>
    %235 = arith.mulf %234, %5 : vector<5x5xf32>
    %cst_47 = arith.constant dense<0.000000e+00> : vector<5xf32>
    %236 = vector.multi_reduction <add>, %235, %cst_47 [0] : vector<5x5xf32> to vector<5xf32>
    %237 = vector.shape_cast %236 : vector<5xf32> to vector<1x5xf32>
    %238 = arith.addf %237, %8 : vector<1x5xf32>
    %c8 = arith.constant 8 : index
    %c0_48 = arith.constant 0 : index
    %239 = vector.load %arg3[%c8, %c0_48] : memref<10x5xf32, #tpu.memory_space<vmem>>, vector<1x5xf32>
    tpu.vector_store %arg3[%c8, %c0_48], %238 {strides = array<i32>} : memref<10x5xf32, #tpu.memory_space<vmem>>, vector<1x5xf32>,
    %240 = vector.extract_strided_slice %0 {offsets = [9, 0], sizes = [1, 5], strides = [1, 1]} : vector<10x5xf32> to vector<1x5xf32>
    %241 = vector.shape_cast %240 : vector<1x5xf32> to vector<1x5xf32>
    %242 = vector.broadcast %241 : vector<1x5xf32> to vector<5x5xf32>
    %243 = arith.mulf %242, %2 : vector<5x5xf32>
    %cst_49 = arith.constant dense<0.000000e+00> : vector<5xf32>
    %244 = vector.multi_reduction <add>, %243, %cst_49 [1] : vector<5x5xf32> to vector<5xf32>
    %245 = vector.shape_cast %244 : vector<5xf32> to vector<5x1xf32>
    %246 = vector.shape_cast %232 : vector<5x1xf32> to vector<5x1xf32>
    %247 = vector.broadcast %246 : vector<5x1xf32> to vector<5x5xf32>
    %248 = arith.mulf %247, %4 : vector<5x5xf32>
    %cst_50 = arith.constant dense<0.000000e+00> : vector<5xf32>
    %249 = vector.multi_reduction <add>, %248, %cst_50 [0] : vector<5x5xf32> to vector<5xf32>
    %250 = vector.shape_cast %249 : vector<5xf32> to vector<1x5xf32>
    %251 = vector.shape_cast %245 : vector<5x1xf32> to vector<5x1xf32>
    %252 = vector.broadcast %251 : vector<5x1xf32> to vector<5x5xf32>
    %253 = arith.mulf %252, %6 : vector<5x5xf32>
    %cst_51 = arith.constant dense<0.000000e+00> : vector<5xf32>
    %254 = vector.multi_reduction <add>, %253, %cst_51 [0] : vector<5x5xf32> to vector<5xf32>
    %255 = vector.shape_cast %254 : vector<5xf32> to vector<1x5xf32>
    %256 = arith.addf %255, %7 : vector<1x5xf32>
    %257 = arith.addf %256, %250 : vector<1x5xf32>
    %258 = math.tanh %257 : vector<1x5xf32>
    %259 = vector.shape_cast %258 : vector<1x5xf32> to vector<1x5xf32>
    %260 = vector.broadcast %259 : vector<1x5xf32> to vector<5x5xf32>
    %261 = arith.mulf %260, %6 : vector<5x5xf32>
    %cst_52 = arith.constant dense<0.000000e+00> : vector<5xf32>
    %262 = vector.multi_reduction <add>, %261, %cst_52 [1] : vector<5x5xf32> to vector<5xf32>
    %263 = vector.shape_cast %262 : vector<5xf32> to vector<5x1xf32>
    %264 = vector.shape_cast %263 : vector<5x1xf32> to vector<5x1xf32>
    %265 = vector.broadcast %264 : vector<5x1xf32> to vector<5x5xf32>
    %266 = arith.mulf %265, %5 : vector<5x5xf32>
    %cst_53 = arith.constant dense<0.000000e+00> : vector<5xf32>
    %267 = vector.multi_reduction <add>, %266, %cst_53 [0] : vector<5x5xf32> to vector<5xf32>
    %268 = vector.shape_cast %267 : vector<5xf32> to vector<1x5xf32>
    %269 = arith.addf %268, %8 : vector<1x5xf32>
    %c9 = arith.constant 9 : index
    %c0_54 = arith.constant 0 : index
    %270 = vector.load %arg3[%c9, %c0_54] : memref<10x5xf32, #tpu.memory_space<vmem>>, vector<1x5xf32>
    tpu.vector_store %arg3[%c9, %c0_54], %269 {strides = array<i32>} : memref<10x5xf32, #tpu.memory_space<vmem>>, vector<1x5xf32>,
    return
  }
}

</mosaic_0001>

<bundles_post_ra>
// kernel: rnn_forward.1
= control target key start
LH: loop header
LB: loop body
LE: loop exit
PB: predicated region body
PF: predicated region fallthrough
CT: control target
= control target key end

     0   :  { %v25_v0 = vlaneseq  ;;  %vm30_vm0 = vcmask 36864   ;;  %v436_v16 = vmov 0   ;;  %vm61_vm1 = vcmask 32768   ;;  %s687_s0 = inlined_call_operand.vmem [shape: f32[10,5], index: 0, kind: input, shape index: {}]   ;;  %s688_s2 = inlined_call_operand.vmem [shape: f32[64,8], index: 2, kind: input, shape index: {}]   ;;  %s689_s1 = inlined_call_operand.vmem [shape: f32[1,5], index: 1, kind: input, shape index: {}]   ;;  %s690_s3 = inlined_call_operand.vmem [shape: f32[10,5], index: 3, kind: output, shape index: {}]  }
   0x1   :  { %v462_v2 = vld [vmem:[%s687_s0] sm:$0xff]  ;;  %v476_v6 = vld [vmem:[%s688_s2 + $0x8] sm:$0xff]  ;;  %414 = vset.pattern.permute.xlu1 %v436_v16  ;;  %415 = vset.pattern.permute.xlu0 %v436_v16  ;;  %v495_v17 = vld [vmem:[%s688_s2 + $0x38] sm:$0xff] }
   0x2   :  { %v457_v1 = vshrl.u32 %v25_v0, 7  ;;  %v471_v5 = vld [vmem:[%s688_s2] sm:$0xff]  ;;  %v512_v34 = vld [vmem:[%s688_s2 + $0x10] sm:$0xff]  ;;  %v517_v35 = vld [vmem:[%s688_s2 + $0x18] sm:$0xff] }
   0x3   :  { %v412_v7 = vld [vmem:[%s689_s1] ss:$0 sm:$0xff]  ;;  %v526_v52 = vld [vmem:[%s688_s2 + $0x28] sm:$0xff]  ;;  %v531_v55 = vld [vmem:[%s688_s2 + $0x30] sm:$0xff] }
   0x4   :  { %v465_v3 = vsub.s32 0, %v457_v1  ;;  %v65_v4 = vsub.s32 1, %v457_v1  ;;  %v40_v11 = vmul.f32 %v412_v7, %v476_v6  ;;  %v110_v23 = vsub.s32 2, %v457_v1  ;;  %v505_v27 = vld [vmem:[%s688_s2 + $0x20] sm:$0xff] }
   0x5   :  { %v140_v61 = vsub.s32 3, %v457_v1  ;;  %v185_v16 = vsub.s32 4, %v457_v1 }
   0x6   :  { %v28_v8 = vrot.slane %v462_v2, %v465_v3  ;;  %v66_v9 = vrot.slane %v462_v2, %v65_v4  ;;  %v41_v15 = vsel %vm30_vm0, %v40_v11, 0.0  ;;  %v111_v24 = vrot.slane %v462_v2, %v110_v23 }
   0x7   :  { %v141_v62 = vrot.slane %v462_v2, %v140_v61 }
   0x8   :  { %v29_v10 = vmul.f32 %v28_v8, %v471_v5  ;;  %v67_v12 = vmul.f32 %v66_v9, %v471_v5  ;;  %v112_v25 = vmul.f32 %v111_v24, %v471_v5 }
   0x9   :  { %v142_v8 = vmul.f32 %v141_v62, %v471_v5 }
   0xa   :  { %v31_v13 = vsel %vm30_vm0, %v29_v10, 0.0  ;;  %v68_v14 = vsel %vm30_vm0, %v67_v12, 0.0  ;;  %v113_v26 = vsel %vm30_vm0, %v112_v25, 0.0 }
   0xb   :  { %32 = vadd.xlane.f32.xlu0 %v31_v13  ;;  %69 = vadd.xlane.f32.xlu1 %v68_v14  ;;  %v143_v10 = vsel %vm30_vm0, %v142_v8, 0.0 }
   0xf   :  { %42 = vadd.xlane.f32.xlu0 %v41_v15 }
  0x13   :  { %114 = vadd.xlane.f32.xlu0 %v113_v26 }
  0x94   :  { %v33_v18 = vpop.xlane.xlu0 %32  ;;  %v70_v28 = vpop.xlane.xlu1 %69 }
  0x95   :  { %v44_v19 = vadd.f32 %v33_v18, %v495_v17  ;;  %v79_v29 = vmul.f32 %v70_v28, %v505_v27  ;;  %v186_v18 = vrot.slane %v462_v2, %v185_v16 }
  0x97   :  { %v80_v30 = vsel %vm30_vm0, %v79_v29, 0.0 }
  0x98   :  { %v43_v20 = vpop.xlane.xlu0 %42  ;;  %v81_v31 = vrot.slane %v80_v30, 4 }
  0x99   :  { %v45_v21 = vadd.f32 %v44_v19, %v43_v20  ;;  %v187_v19 = vmul.f32 %v186_v18, %v471_v5 }
  0x9a   :  { %v82_v32 = vadd.f32 %v81_v31, %v80_v30 }
  0x9b   :  { %416 = vtanh.f32 %v45_v21  ;;  %v188_v20 = vsel %vm30_vm0, %v187_v19, 0.0 }
  0x9c   :  { %v83_v33 = vrot.slane %v82_v32, 2  ;;  %v115_v11 = vpop.xlane.xlu0 %114 }
  0x9d   :  { %v120_v12 = vadd.f32 %v115_v11, %v495_v17  ;;  %v260_v11 = vsub.s32 6, %v457_v1 }
  0x9e   :  { %v84_v39 = vadd.f32 %v83_v33, %v82_v32 }
  0xa0   :  { %v85_v44 = vrot.slane %v84_v39, 1 }
  0xa2   :  { %v86_v49 = vadd.f32 %v85_v44, %v84_v39 }
  0xa4   :  { %v87_v56 = vadd.f32 %v86_v49, %v526_v52 }
  0xa8   :  { %v417_v22 = vpop.eup %416 }
  0xa9   :  { %49 = vperm.xlu1 %414, %v417_v22  }
  0xcd   :  { %189 = vadd.xlane.f32.xlu1 %v188_v20 }
 0x124   :  { %v50_v36 = vpop.permute.xlu1 %49 }
 0x125   :  { %v52_v37 = vmul.f32 %v50_v36, %v517_v35  ;;  %v71_v38 = vmul.f32 %v50_v36, %v512_v34 }
 0x127   :  { %v53_v40 = vsel %vm30_vm0, %v52_v37, 0.0  ;;  %v72_v41 = vsel %vm30_vm0, %v71_v38, 0.0 }
 0x128   :  { %v54_v42 = vrot.slane %v53_v40, 4  ;;  %v73_v43 = vrot.slane %v72_v41, 4 }
 0x12a   :  { %v55_v45 = vadd.f32 %v54_v42, %v53_v40  ;;  %v74_v46 = vadd.f32 %v73_v43, %v72_v41 }
 0x12c   :  { %v56_v47 = vrot.slane %v55_v45, 2  ;;  %v75_v48 = vrot.slane %v74_v46, 2 }
 0x12e   :  { %v57_v50 = vadd.f32 %v56_v47, %v55_v45  ;;  %v76_v51 = vadd.f32 %v75_v48, %v74_v46 }
 0x130   :  { %v58_v53 = vrot.slane %v57_v50, 1  ;;  %v77_v54 = vrot.slane %v76_v51, 1 }
 0x132   :  { %v59_v57 = vadd.f32 %v58_v53, %v57_v50  ;;  %v78_v58 = vadd.f32 %v77_v54, %v76_v51  ;;  %v215_v54 = vsub.s32 5, %v457_v1 }
 0x134   :  { %v60_v59 = vadd.f32 %v59_v57, %v531_v55  ;;  %v88_v60 = vadd.f32 %v87_v56, %v78_v58  ;;  %v216_v56 = vrot.slane %v462_v2, %v215_v54 }
 0x136   :  { %62 = vst.msk [vmem:[%s690_s3] sm:$0x1] %vm61_vm1, %v60_v59  ;;  %418 = vtanh.f32 %v88_v60  ;;  %v217_v60 = vmul.f32 %v216_v56, %v471_v5 }
 0x138   :  { %v218_v62 = vsel %vm30_vm0, %v217_v60, 0.0 }
 0x143   :  { %v419_v63 = vpop.eup %418 }
 0x144   :  { %v542_v0 = vrot.slane %v419_v63, %v465_v3 }
 0x146   :  { %v116_v7 = vmul.f32 %v542_v0, %v476_v6 }
 0x148   :  { %v117_v9 = vsel %vm30_vm0, %v116_v7, 0.0 }
 0x149   :  { %118 = vadd.xlane.f32.xlu0 %v117_v9 }
 0x14d   :  { %144 = vadd.xlane.f32.xlu0 %v143_v10 }
 0x156   :  { %v190_v63 = vpop.xlane.xlu1 %189 }
 0x157   :  { %v195_v7 = vadd.f32 %v190_v63, %v495_v17  ;;  %v15_v63 = vld [vmem:[%s687_s0 + $0x8] sm:$0x3] }
 0x1d2   :  { %v119_v13 = vpop.xlane.xlu0 %118 }
 0x1d3   :  { %v121_v14 = vadd.f32 %v120_v12, %v119_v13  ;;  %v261_v12 = vrot.slane %v462_v2, %v260_v11 }
 0x1d5   :  { %420 = vtanh.f32 %v121_v14  ;;  %v262_v13 = vmul.f32 %v261_v12, %v471_v5 }
 0x1d6   :  { %v145_v21 = vpop.xlane.xlu0 %144 }
 0x1d7   :  { %v154_v22 = vmul.f32 %v145_v21, %v505_v27  ;;  %v263_v14 = vsel %vm30_vm0, %v262_v13, 0.0 }
 0x1d9   :  { %v155_v23 = vsel %vm30_vm0, %v154_v22, 0.0 }
 0x1da   :  { %v156_v24 = vrot.slane %v155_v23, 4 }
 0x1dc   :  { %v157_v25 = vadd.f32 %v156_v24, %v155_v23 }
 0x1de   :  { %v158_v26 = vrot.slane %v157_v25, 2 }
 0x1e0   :  { %v159_v31 = vadd.f32 %v158_v26, %v157_v25 }
 0x1e2   :  { %v421_v15 = vpop.eup %420  ;;  %v160_v38 = vrot.slane %v159_v31, 1 }
 0x1e3   :  { %125 = vperm.xlu0 %415, %v421_v15   ;;  %v290_v15 = vsub.s32 7, %v457_v1 }
 0x1e4   :  { %v161_v43 = vadd.f32 %v160_v38, %v159_v31 }
 0x1e5   :  { %v291_v16 = vrot.slane %v462_v2, %v290_v15 }
 0x1e6   :  { %v162_v48 = vadd.f32 %v161_v43, %v526_v52 }
 0x1e7   :  { %v292_v18 = vmul.f32 %v291_v16, %v471_v5 }
 0x1e9   :  { %v293_v19 = vsel %vm30_vm0, %v292_v18, 0.0 }
 0x25e   :  { %v126_v28 = vpop.permute.xlu0 %125 }
 0x25f   :  { %v128_v29 = vmul.f32 %v126_v28, %v517_v35  ;;  %v146_v30 = vmul.f32 %v126_v28, %v512_v34 }
 0x261   :  { %v129_v32 = vsel %vm30_vm0, %v128_v29, 0.0  ;;  %v147_v33 = vsel %vm30_vm0, %v146_v30, 0.0 }
 0x262   :  { %v130_v36 = vrot.slane %v129_v32, 4  ;;  %v148_v37 = vrot.slane %v147_v33, 4 }
 0x264   :  { %v131_v39 = vadd.f32 %v130_v36, %v129_v32  ;;  %v149_v40 = vadd.f32 %v148_v37, %v147_v33 }
 0x266   :  { %v132_v41 = vrot.slane %v131_v39, 2  ;;  %v150_v42 = vrot.slane %v149_v40, 2 }
 0x268   :  { %v133_v44 = vadd.f32 %v132_v41, %v131_v39  ;;  %v151_v45 = vadd.f32 %v150_v42, %v149_v40 }
 0x26a   :  { %v134_v46 = vrot.slane %v133_v44, 1  ;;  %v152_v47 = vrot.slane %v151_v45, 1 }
 0x26c   :  { %v135_v49 = vadd.f32 %v134_v46, %v133_v44  ;;  %v153_v50 = vadd.f32 %v152_v47, %v151_v45 }
 0x26e   :  { %v136_v51 = vadd.f32 %v135_v49, %v531_v55  ;;  %v163_v53 = vadd.f32 %v162_v48, %v153_v50 }
 0x270   :  { %137 = vst.msk [vmem:[%s690_s3 + $0x2] sm:$0x1] %vm61_vm1, %v136_v51  ;;  %422 = vtanh.f32 %v163_v53 }
 0x27d   :  { %v423_v57 = vpop.eup %422 }
 0x27e   :  { %v569_v58 = vrot.slane %v423_v57, %v465_v3 }
 0x280   :  { %v191_v59 = vmul.f32 %v569_v58, %v476_v6 }
 0x282   :  { %v192_v61 = vsel %vm30_vm0, %v191_v59, 0.0 }
 0x283   :  { %193 = vadd.xlane.f32.xlu1 %v192_v61 }
 0x287   :  { %219 = vadd.xlane.f32.xlu1 %v218_v62 }
 0x28b   :  { %264 = vadd.xlane.f32.xlu1 %v263_v14 }
 0x28f   :  { %294 = vadd.xlane.f32.xlu1 %v293_v19 }
 0x30c   :  { %v194_v8 = vpop.xlane.xlu1 %193 }
 0x30d   :  { %v196_v9 = vadd.f32 %v195_v7, %v194_v8  ;;  %v336_v7 = vrot.slane %v15_v63, %v465_v3 }
 0x30f   :  { %424 = vtanh.f32 %v196_v9  ;;  %v337_v8 = vmul.f32 %v336_v7, %v471_v5 }
 0x310   :  { %v220_v20 = vpop.xlane.xlu1 %219 }
 0x311   :  { %v229_v21 = vmul.f32 %v220_v20, %v505_v27  ;;  %v338_v9 = vsel %vm30_vm0, %v337_v8, 0.0 }
 0x313   :  { %v230_v22 = vsel %vm30_vm0, %v229_v21, 0.0 }
 0x314   :  { %v231_v23 = vrot.slane %v230_v22, 4  ;;  %v265_v57 = vpop.xlane.xlu1 %264 }
 0x315   :  { %v270_v59 = vadd.f32 %v265_v57, %v495_v17 }
 0x316   :  { %v232_v24 = vadd.f32 %v231_v23, %v230_v22 }
 0x318   :  { %v233_v25 = vrot.slane %v232_v24, 2  ;;  %v295_v14 = vpop.xlane.xlu1 %294 }
 0x319   :  { %v304_v15 = vmul.f32 %v295_v14, %v505_v27 }
 0x31a   :  { %v234_v30 = vadd.f32 %v233_v25, %v232_v24 }
 0x31b   :  { %v305_v16 = vsel %vm30_vm0, %v304_v15, 0.0 }
 0x31c   :  { %v425_v10 = vpop.eup %424  ;;  %v235_v36 = vrot.slane %v234_v30, 1  ;;  %v306_v18 = vrot.slane %v305_v16, 4 }
 0x31d   :  { %200 = vperm.xlu0 %415, %v425_v10   ;;  %v94_v10 = vmul.f32 %v542_v0, %v505_v27 }
 0x31e   :  { %v236_v41 = vadd.f32 %v235_v36, %v234_v30  ;;  %v307_v19 = vadd.f32 %v306_v18, %v305_v16 }
 0x31f   :  { %v95_v11 = vsel %vm30_vm0, %v94_v10, 0.0 }
 0x320   :  { %v237_v46 = vadd.f32 %v236_v41, %v526_v52  ;;  %v308_v20 = vrot.slane %v307_v19, 2 }
 0x322   :  { %v309_v23 = vadd.f32 %v308_v20, %v307_v19 }
 0x398   :  { %v201_v26 = vpop.permute.xlu0 %200 }
 0x399   :  { %v203_v28 = vmul.f32 %v201_v26, %v517_v35  ;;  %v221_v29 = vmul.f32 %v201_v26, %v512_v34 }
 0x39b   :  { %v204_v2 = vsel %vm30_vm0, %v203_v28, 0.0  ;;  %v222_v31 = vsel %vm30_vm0, %v221_v29, 0.0  ;;  %v310_v29 = vrot.slane %v309_v23, 1 }
 0x39c   :  { %v205_v32 = vrot.slane %v204_v2, 4  ;;  %v223_v33 = vrot.slane %v222_v31, 4 }
 0x39e   :  { %v206_v37 = vadd.f32 %v205_v32, %v204_v2  ;;  %v224_v38 = vadd.f32 %v223_v33, %v222_v31  ;;  %v311_v33 = vadd.f32 %v310_v29, %v309_v23 }
 0x3a0   :  { %v207_v39 = vrot.slane %v206_v37, 2  ;;  %v225_v40 = vrot.slane %v224_v38, 2 }
 0x3a2   :  { %v208_v42 = vadd.f32 %v207_v39, %v206_v37  ;;  %v226_v43 = vadd.f32 %v225_v40, %v224_v38  ;;  %v312_v40 = vadd.f32 %v311_v33, %v526_v52 }
 0x3a4   :  { %v209_v44 = vrot.slane %v208_v42, 1  ;;  %v227_v45 = vrot.slane %v226_v43, 1 }
 0x3a6   :  { %v210_v47 = vadd.f32 %v209_v44, %v208_v42  ;;  %v228_v48 = vadd.f32 %v227_v45, %v226_v43  ;;  %v366_v45 = vrot.slane %v15_v63, %v65_v4 }
 0x3a8   :  { %v211_v49 = vadd.f32 %v210_v47, %v531_v55  ;;  %v238_v50 = vadd.f32 %v237_v46, %v228_v48 }
 0x3aa   :  { %212 = vst.msk [vmem:[%s690_s3 + $0x4] sm:$0x1] %vm61_vm1, %v211_v49  ;;  %426 = vtanh.f32 %v238_v50  ;;  %v367_v50 = vmul.f32 %v366_v45, %v471_v5 }
 0x3b7   :  { %v427_v51 = vpop.eup %426 }
 0x3b8   :  { %v243_v53 = vrot.slane %v427_v51, %v465_v3 }
 0x3ba   :  { %v266_v54 = vmul.f32 %v243_v53, %v476_v6  ;;  %v244_v12 = vmul.f32 %v243_v53, %v505_v27 }
 0x3bc   :  { %v267_v56 = vsel %vm30_vm0, %v266_v54, 0.0  ;;  %v245_v13 = vsel %vm30_vm0, %v244_v12, 0.0  ;;  %v368_v54 = vsel %vm30_vm0, %v367_v50, 0.0 }
 0x3bd   :  { %268 = vadd.xlane.f32.xlu0 %v267_v56 }
 0x446   :  { %v269_v60 = vpop.xlane.xlu0 %268 }
 0x447   :  { %v271_v61 = vadd.f32 %v270_v59, %v269_v60 }
 0x449   :  { %428 = vtanh.f32 %v271_v61 }
 0x456   :  { %v429_v62 = vpop.eup %428 }
 0x457   :  { %275 = vperm.xlu1 %414, %v429_v62  }
 0x47b   :  { %339 = vadd.xlane.f32.xlu1 %v338_v9 }
 0x47f   :  { %96 = vadd.xlane.f32.xlu1 %v95_v11 }
 0x483   :  { %246 = vadd.xlane.f32.xlu1 %v245_v13 }
 0x4d2   :  { %v276_v21 = vpop.permute.xlu1 %275 }
 0x4d3   :  { %v278_v0 = vmul.f32 %v276_v21, %v517_v35  ;;  %v296_v22 = vmul.f32 %v276_v21, %v512_v34 }
 0x4d5   :  { %v279_v24 = vsel %vm30_vm0, %v278_v0, 0.0  ;;  %v297_v25 = vsel %vm30_vm0, %v296_v22, 0.0 }
 0x4d6   :  { %v280_v26 = vrot.slane %v279_v24, 4  ;;  %v298_v28 = vrot.slane %v297_v25, 4 }
 0x4d8   :  { %v281_v30 = vadd.f32 %v280_v26, %v279_v24  ;;  %v299_v2 = vadd.f32 %v298_v28, %v297_v25 }
 0x4da   :  { %v282_v31 = vrot.slane %v281_v30, 2  ;;  %v300_v32 = vrot.slane %v299_v2, 2 }
 0x4dc   :  { %v283_v36 = vadd.f32 %v282_v31, %v281_v30  ;;  %v301_v37 = vadd.f32 %v300_v32, %v299_v2 }
 0x4de   :  { %v284_v38 = vrot.slane %v283_v36, 1  ;;  %v302_v39 = vrot.slane %v301_v37, 1 }
 0x4e0   :  { %v285_v41 = vadd.f32 %v284_v38, %v283_v36  ;;  %v303_v42 = vadd.f32 %v302_v39, %v301_v37 }
 0x4e2   :  { %v286_v43 = vadd.f32 %v285_v41, %v531_v55  ;;  %v313_v44 = vadd.f32 %v312_v40, %v303_v42 }
 0x4e4   :  { %287 = vst.msk [vmem:[%s690_s3 + $0x6] sm:$0x1] %vm61_vm1, %v286_v43  ;;  %430 = vtanh.f32 %v313_v44 }
 0x4f1   :  { %v431_v46 = vpop.eup %430 }
 0x4f2   :  { %v318_v47 = vrot.slane %v431_v46, %v465_v3 }
 0x4f4   :  { %v341_v48 = vmul.f32 %v318_v47, %v476_v6  ;;  %v319_v49 = vmul.f32 %v318_v47, %v505_v27 }
 0x4f6   :  { %v342_v51 = vsel %vm30_vm0, %v341_v48, 0.0  ;;  %v320_v53 = vsel %vm30_vm0, %v319_v49, 0.0 }
 0x4f7   :  { %343 = vadd.xlane.f32.xlu0 %v342_v51  ;;  %321 = vadd.xlane.f32.xlu1 %v320_v53 }
 0x4fb   :  { %369 = vadd.xlane.f32.xlu0 %v368_v54 }
 0x504   :  { %v340_v1 = vpop.xlane.xlu1 %339 }
 0x505   :  { %v345_v18 = vadd.f32 %v340_v1, %v495_v17  ;;  %v169_v17 = vmul.f32 %v569_v58, %v505_v27 }
 0x507   :  { %v170_v31 = vsel %vm30_vm0, %v169_v17, 0.0 }
 0x508   :  { %v97_v4 = vpop.xlane.xlu1 %96 }
 0x509   :  { %v98_v56 = vmul.f32 %v97_v4, %v517_v35 }
 0x50b   :  { %v99_v57 = vsel %vm30_vm0, %v98_v56, 0.0 }
 0x50c   :  { %v100_v6 = vrot.slane %v99_v57, 4  ;;  %v247_v59 = vpop.xlane.xlu1 %246 }
 0x50d   :  { %v248_v60 = vmul.f32 %v247_v59, %v517_v35 }
 0x50e   :  { %v101_v5 = vadd.f32 %v100_v6, %v99_v57 }
 0x50f   :  { %v249_v61 = vsel %vm30_vm0, %v248_v60, 0.0 }
 0x510   :  { %v102_v62 = vrot.slane %v101_v5, 2  ;;  %v250_v63 = vrot.slane %v249_v61, 4 }
 0x512   :  { %v103_v7 = vadd.f32 %v102_v62, %v101_v5  ;;  %v251_v8 = vadd.f32 %v250_v63, %v249_v61 }
 0x514   :  { %v104_v9 = vrot.slane %v103_v7, 1  ;;  %v252_v10 = vrot.slane %v251_v8, 2 }
 0x516   :  { %v105_v11 = vadd.f32 %v104_v9, %v103_v7  ;;  %v253_v12 = vadd.f32 %v252_v10, %v251_v8 }
 0x518   :  { %v106_v13 = vadd.f32 %v105_v11, %v531_v55  ;;  %v254_v14 = vrot.slane %v253_v12, 1 }
 0x51a   :  { %107 = vst.msk [vmem:[%s690_s3 + $0x1] sm:$0x1] %vm61_vm1, %v106_v13  ;;  %v255_v15 = vadd.f32 %v254_v14, %v253_v12 }
 0x51c   :  { %v256_v16 = vadd.f32 %v255_v15, %v531_v55 }
 0x51e   :  { %257 = vst.msk [vmem:[%s690_s3 + $0x5] sm:$0x1] %vm61_vm1, %v256_v16 }
 0x580   :  { %v344_v19 = vpop.xlane.xlu0 %343  ;;  %v322_v20 = vpop.xlane.xlu1 %321 }
 0x581   :  { %v346_v21 = vadd.f32 %v345_v18, %v344_v19  ;;  %v323_v0 = vmul.f32 %v322_v20, %v517_v35 }
 0x583   :  { %432 = vtanh.f32 %v346_v21  ;;  %v324_v22 = vsel %vm30_vm0, %v323_v0, 0.0 }
 0x584   :  { %v325_v23 = vrot.slane %v324_v22, 4  ;;  %v370_v32 = vpop.xlane.xlu0 %369 }
 0x585   :  { %v379_v33 = vmul.f32 %v370_v32, %v505_v27 }
 0x586   :  { %v326_v24 = vadd.f32 %v325_v23, %v324_v22 }
 0x587   :  { %v380_v36 = vsel %vm30_vm0, %v379_v33, 0.0 }
 0x588   :  { %v327_v25 = vrot.slane %v326_v24, 2  ;;  %v381_v37 = vrot.slane %v380_v36, 4 }
 0x58a   :  { %v328_v26 = vadd.f32 %v327_v25, %v326_v24  ;;  %v382_v38 = vadd.f32 %v381_v37, %v380_v36 }
 0x58c   :  { %v329_v28 = vrot.slane %v328_v26, 1  ;;  %v383_v39 = vrot.slane %v382_v38, 2 }
 0x58e   :  { %v330_v29 = vadd.f32 %v329_v28, %v328_v26  ;;  %v384_v43 = vadd.f32 %v383_v39, %v382_v38 }
 0x590   :  { %v433_v30 = vpop.eup %432  ;;  %v331_v2 = vadd.f32 %v330_v29, %v531_v55  ;;  %v385_v47 = vrot.slane %v384_v43, 1 }
 0x591   :  { %350 = vperm.xlu0 %415, %v433_v30  }
 0x592   :  { %332 = vst.msk [vmem:[%s690_s3 + $0x7] sm:$0x1] %vm61_vm1, %v331_v2  ;;  %v386_v53 = vadd.f32 %v385_v47, %v384_v43 }
 0x594   :  { %v387_v57 = vadd.f32 %v386_v53, %v526_v52 }
 0x5b0   :  { %171 = vadd.xlane.f32.xlu0 %v170_v31 }
 0x60c   :  { %v351_v40 = vpop.permute.xlu0 %350 }
 0x60d   :  { %v353_v41 = vmul.f32 %v351_v40, %v517_v35  ;;  %v371_v42 = vmul.f32 %v351_v40, %v512_v34 }
 0x60f   :  { %v354_v44 = vsel %vm30_vm0, %v353_v41, 0.0  ;;  %v372_v58 = vsel %vm30_vm0, %v371_v42, 0.0 }
 0x610   :  { %v355_v45 = vrot.slane %v354_v44, 4  ;;  %v373_v46 = vrot.slane %v372_v58, 4 }
 0x612   :  { %v356_v48 = vadd.f32 %v355_v45, %v354_v44  ;;  %v374_v49 = vadd.f32 %v373_v46, %v372_v58 }
 0x614   :  { %v357_v50 = vrot.slane %v356_v48, 2  ;;  %v375_v51 = vrot.slane %v374_v49, 2 }
 0x616   :  { %v358_v54 = vadd.f32 %v357_v50, %v356_v48  ;;  %v376_v1 = vadd.f32 %v375_v51, %v374_v49 }
 0x618   :  { %v359_v4 = vrot.slane %v358_v54, 1  ;;  %v377_v56 = vrot.slane %v376_v1, 1 }
 0x61a   :  { %v360_v34 = vadd.f32 %v359_v4, %v358_v54  ;;  %v378_v6 = vadd.f32 %v377_v56, %v376_v1 }
 0x61c   :  { %v361_v59 = vadd.f32 %v360_v34, %v531_v55  ;;  %v388_v60 = vadd.f32 %v387_v57, %v378_v6 }
 0x61e   :  { %362 = vst.msk [vmem:[%s690_s3 + $0x8] sm:$0x1] %vm61_vm1, %v361_v59  ;;  %434 = vtanh.f32 %v388_v60 }
 0x62b   :  { %v435_v5 = vpop.eup %434 }
 0x62c   :  { %v393_v61 = vrot.slane %v435_v5, %v465_v3 }
 0x62e   :  { %v394_v62 = vmul.f32 %v393_v61, %v505_v27 }
 0x630   :  { %v395_v63 = vsel %vm30_vm0, %v394_v62, 0.0 }
 0x631   :  { %396 = vadd.xlane.f32.xlu1 %v395_v63 }
 0x639   :  { %v172_v52 = vpop.xlane.xlu0 %171 }
 0x63a   :  { %v173_v7 = vmul.f32 %v172_v52, %v517_v35 }
 0x63c   :  { %v174_v8 = vsel %vm30_vm0, %v173_v7, 0.0 }
 0x63d   :  { %v175_v9 = vrot.slane %v174_v8, 4 }
 0x63f   :  { %v176_v10 = vadd.f32 %v175_v9, %v174_v8 }
 0x641   :  { %v177_v11 = vrot.slane %v176_v10, 2 }
 0x643   :  { %v178_v12 = vadd.f32 %v177_v11, %v176_v10 }
 0x645   :  { %v179_v13 = vrot.slane %v178_v12, 1 }
 0x647   :  { %v180_v14 = vadd.f32 %v179_v13, %v178_v12 }
 0x649   :  { %v181_v15 = vadd.f32 %v180_v14, %v531_v55 }
 0x64b   :  { %182 = vst.msk [vmem:[%s690_s3 + $0x3] sm:$0x1] %vm61_vm1, %v181_v15 }
 0x6ba   :  { %v397_v3 = vpop.xlane.xlu1 %396 }
 0x6bb   :  { %v398_v27 = vmul.f32 %v397_v3, %v517_v35 }
 0x6bd   :  { %v399_v16 = vsel %vm30_vm0, %v398_v27, 0.0 }
 0x6be   :  { %v400_v18 = vrot.slane %v399_v16, 4 }
 0x6c0   :  { %v401_v19 = vadd.f32 %v400_v18, %v399_v16 }
 0x6c2   :  { %v402_v20 = vrot.slane %v401_v19, 2 }
 0x6c4   :  { %v403_v21 = vadd.f32 %v402_v20, %v401_v19 }
 0x6c6   :  { %v404_v0 = vrot.slane %v403_v21, 1 }
 0x6c8   :  { %v405_v22 = vadd.f32 %v404_v0, %v403_v21 }
 0x6ca   :  { %v406_v23 = vadd.f32 %v405_v22, %v531_v55 }
 0x6cc   :  { %407 = vst.msk [vmem:[%s690_s3 + $0x9] sm:$0x1] %vm61_vm1, %v406_v23 }

</bundles_post_ra>
